<compile_context>
chip_gen: v5e
topology: v5e:2x2
jax: 0.10.0
libtpu: 0.0.40
codegen_flags: <defaults>
</compile_context>

<pallas_src>
import functools

import numpy as np

import jax
import jax.numpy as jnp
from jax.experimental import pallas as pl
from jax.experimental.pallas import tpu as pltpu

# ----------------------------- configuration --------------------------------
CFG = dict(
    recurrent_dim=32,
    discrete_dim=16,      # K: classes per categorical
    stochastic_dim=8,     # S: number of categoricals
    unimix=0.01,
    dynamics_predictor=dict(hidden_dim=64, num_layers=2),
)
LN_EPS = 1e-5


def _round_up(x, m):
    return ((x + m - 1) // m) * m


def _choose_tiling(b, tb_max=1024, row_align=16):
    """Pick batch tile TB and grid size.

    Big tiles amortise the ~0.35us per-grid-step overhead; once the batch is
    large enough we force >=2 tiles so the 'parallel' grid axis can shard
    across both TensorCores on v7x.  row_align=16 keeps the bf16 output block
    on full packed sublane tiles.  Worst-case double-buffered VMEM at TB=1024
    (~2 MiB) is far below every generation's limit, so no explicit
    vmem_limit_bytes is needed.
    """
    tiles = max(1, -(-b // tb_max))
    if b >= 4 * row_align:          # batch big enough that a 2-way split helps
        tiles = max(tiles, 2)
    tb = _round_up(-(-b // tiles), row_align)
    tiles = -(-b // tb)
    return tb, tiles, tb * tiles


# ------------------------------- kernel -------------------------------------
def _dyn_kernel(S, K, unimix,
                h_ref,      # (TB, Din)   f32   recurrent state tile
                u_ref,      # (TB, S)     f32   one uniform per categorical
                w1_ref,     # (Din, H)    bf16  \
                w2_ref,     # (H, H)      bf16   } resident MLP weights
                wo_ref,     # (H, SK)     bf16  /  (wo has mean-centering folded)
                vec_ref,    # (16, SK)    f32   packed bias/LN/sampling rows
                cmat_ref,   # (SK, 2*SK)  f32   [block-diag | block-lower-tri]
                ubc_ref,    # (S, SK)     f32   segment-broadcast matrix
                probs_ref,  # (TB, SK)    f32   unimixed categorical probs
                stoch_ref):  # (TB, SK)   bf16  one-hot categorical sample
    SK = S * K
    H = w1_ref.shape[1]
    f32 = jnp.float32

    vecs = vec_ref[...]
    b1, g1, be1 = vecs[0:1, :H], vecs[1:2, :H], vecs[2:3, :H]
    b2, g2, be2 = vecs[3:4, :H], vecs[4:5, :H], vecs[5:6, :H]
    bo = vecs[6:7, :]       # output bias (segment-mean-centered)
    cdf0 = vecs[7:8, :]     # unimix*(pos+1)/K : uniform-mixture part of the CDF
    bump = vecs[8:9, :]     # 1.0 on the last lane of each segment
    rank = vecs[9:10, :]    # float(pos) = lane index within its segment

    def linear_ln_silu(x, w_ref, b, gamma, beta):
        # bf16 MXU operands, f32 accumulation; LayerNorm in one pass.
        y = jnp.dot(x.astype(w_ref.dtype), w_ref[...],
                    preferred_element_type=f32) + b
        mu = jnp.mean(y, axis=-1, keepdims=True)
        var = jnp.maximum(jnp.mean(y * y, axis=-1, keepdims=True) - mu * mu, 0.0)
        y = (y - mu) * jax.lax.rsqrt(var + LN_EPS) * gamma + beta
        return y * jax.nn.sigmoid(y)                      # SiLU

    x = h_ref[...].astype(f32)
    x = linear_ln_silu(x, w1_ref, b1, g1, be1)
    x = linear_ln_silu(x, w2_ref, b2, g2, be2)

    # wo/bo have per-segment mean-centering folded in (see pack_params): these
    # logits equal the model logits minus each segment's mean, which leaves
    # softmax / probs / sampling unchanged but keeps exp() far from f32
    # underflow even when segments sit at very different offsets.  The -85
    # clamp below can only distort a segment whose own logit spread exceeds
    # ~85 — not reachable with LayerNorm-bounded activations.
    logits = jnp.dot(x.astype(wo_ref.dtype), wo_ref[...],
                     preferred_element_type=f32) + bo      # (TB, SK) lane-dense

    m = jnp.max(logits, axis=-1, keepdims=True)            # global row max
    e = jnp.exp(jnp.maximum(logits - m, -85.0))

    # One fused MXU matmul against the resident [block-diag | lower-tri]
    # constant gives every lane its segment's sum and inclusive cumsum.
    cmat = cmat_ref[...]
    sums = jnp.dot(e, cmat, preferred_element_type=f32)    # (TB, 2*SK)
    seg_sum, cs_e = sums[:, :SK], sums[:, SK:]

    inv = pl.reciprocal(seg_sum, approx=True)               # EUP
    inv = inv * (2.0 - seg_sum * inv)                       # one Newton step
    scale = (1.0 - unimix) * inv
    probs = e * scale + (unimix / K)
    probs_ref[...] = probs

    # Lane-dense inverse-CDF categorical sample:
    #   cdf  = inclusive per-segment CDF of probs (cumsum via the same matmul)
    #   u    = per-segment uniform broadcast to its K lanes (tiny MXU matmul)
    #   idx  = #(lanes in segment with cdf <= u) -> sampled class index,
    #          via one block-diag count matmul.  `bump` pushes the last lane's
    #          threshold above 1, so idx is always in [0, K-1] and exactly one
    #          lane per segment matches rank == idx.
    cdf = cs_e * scale + cdf0
    u = jnp.dot(u_ref[...], ubc_ref[...], preferred_element_type=f32)
    ge = (u >= cdf + bump).astype(f32)
    idx = jnp.dot(ge, cmat[:, :SK], preferred_element_type=f32)
    stoch_ref[...] = (jnp.abs(rank - idx) < 0.5).astype(stoch_ref.dtype)


# ------------------------------- wrapper -------------------------------------
def dynamics_predictor_forward(h, params, sample_key, cfg=CFG):
    B, Din = h.shape
    H = cfg["dynamics_predictor"]["hidden_dim"]
    S = cfg["stochastic_dim"]
    K = cfg["discrete_dim"]
    SK = S * K

    TB, num_tiles, B_pad = _choose_tiling(B)
    if B_pad != B:
        h = jnp.pad(h, ((0, B_pad - B), (0, 0)))

    # One uniform in [0,1) per (row, categorical) — 32 B/row of noise DMA.
    u = jax.random.uniform(sample_key, (B_pad, S), jnp.float32)

    kernel = functools.partial(_dyn_kernel, S, K, float(cfg["unimix"]))

    tiled = lambda w: pl.BlockSpec((TB, w), lambda i: (i, 0))
    resident = lambda shape: pl.BlockSpec(shape, lambda i: (0,) * len(shape))

    probs2d, stoch = pl.pallas_call(
        kernel,
        out_shape=(
            jax.ShapeDtypeStruct((B_pad, SK), jnp.float32),
            jax.ShapeDtypeStruct((B_pad, SK), jnp.bfloat16),
        ),
        grid=(num_tiles,),
        in_specs=[
            tiled(Din),                 # h          (batch-tiled)
            tiled(S),                   # uniforms   (batch-tiled, 8 lanes)
            resident((Din, H)),         # w1   (stay resident across tiles)
            resident((H, H)),           # w2
            resident((H, SK)),          # w_out (mean-centering folded in)
            resident((16, SK)),         # packed bias/LN/sampling rows
            resident((SK, 2 * SK)),     # [block-diag | block-lower-tri]
            resident((S, SK)),          # segment-broadcast matrix for u
        ],
        out_specs=[
            tiled(SK),                  # probs, lane-dense (B, S*K) f32
            tiled(SK),                  # one-hot sample, lane-dense bf16
        ],
        compiler_params=pltpu.CompilerParams(
            dimension_semantics=("parallel",)),   # megacore / dual-TC sharding
    )(h, u, params["w1"], params["w2"], params["wo"],
      params["vecs"], params["cmat"], params["ubc"])

    probs = probs2d[:B].reshape(B, S, K)   # 3-D view produced in the wrapper
    return probs, stoch[:B]


# ------------------------- parameter packing ---------------------------------
def pack_params(raw, cfg=CFG):
    """Pack raw f32 module parameters into the kernel's layout.

    raw: dict with w1 (Din,H), b1, ln1_g, ln1_b, w2 (H,H), b2, ln2_g, ln2_b,
         wo (H,SK), bo (SK,)  — all float32.
    """
    S, K = cfg["stochastic_dim"], cfg["discrete_dim"]
    SK = S * K
    unimix = float(cfg["unimix"])
    r = {k: np.asarray(v, np.float32) for k, v in raw.items()}

    j = np.arange(SK)
    seg, pos = j // K, j % K
    bd = (seg[:, None] == seg[None, :]).astype(np.float32)          # block-diag
    lt = (bd * (j[:, None] <= j[None, :])).astype(np.float32)       # blk lower-tri
    cmat = np.concatenate([bd, lt], axis=1)                         # (SK, 2*SK)
    ubc = (np.arange(S)[:, None] == seg[None, :]).astype(np.float32)  # (S, SK)

    # Fold per-segment mean-centering of the logits into the output layer
    # (softmax over each K-wide segment is shift-invariant) — zero kernel cost.
    center = np.eye(SK, dtype=np.float32) - bd / K
    wo_c = r["wo"] @ center
    bo_c = r["bo"] @ center

    def row(v):
        v = np.asarray(v, np.float32).reshape(-1)
        return np.pad(v, (0, SK - v.shape[0]))[None, :]

    vecs = np.concatenate([
        row(r["b1"]), row(r["ln1_g"]), row(r["ln1_b"]),
        row(r["b2"]), row(r["ln2_g"]), row(r["ln2_b"]),
        row(bo_c),
        row(unimix * (pos + 1.0) / K),            # CDF uniform-mixture offset
        row((pos == K - 1).astype(np.float32)),   # last-lane bump
        row(pos.astype(np.float32)),              # within-segment rank
        np.zeros((6, SK), np.float32),            # pad to 16 sublane rows
    ], axis=0)                                    # (16, SK)

    return dict(
        w1=jnp.asarray(r["w1"], jnp.bfloat16),
        w2=jnp.asarray(r["w2"], jnp.bfloat16),
        wo=jnp.asarray(wo_c, jnp.bfloat16),
        vecs=jnp.asarray(vecs, jnp.float32),
        cmat=jnp.asarray(cmat, jnp.float32),
        ubc=jnp.asarray(ubc, jnp.float32),
    )


def init_params(key, cfg=CFG):
    Din = cfg["recurrent_dim"]
    H = cfg["dynamics_predictor"]["hidden_dim"]
    SK = cfg["stochastic_dim"] * cfg["discrete_dim"]
    ks = jax.random.split(key, 3)

    def lin(k, fi, fo):
        return jax.random.normal(k, (fi, fo), jnp.float32) / jnp.sqrt(jnp.float32(fi))

    raw = dict(
        w1=lin(ks[0], Din, H), b1=jnp.zeros((H,), jnp.float32),
        ln1_g=jnp.ones((H,), jnp.float32), ln1_b=jnp.zeros((H,), jnp.float32),
        w2=lin(ks[1], H, H), b2=jnp.zeros((H,), jnp.float32),
        ln2_g=jnp.ones((H,), jnp.float32), ln2_b=jnp.zeros((H,), jnp.float32),
        wo=lin(ks[2], H, SK), bo=jnp.zeros((SK,), jnp.float32),
    )
    return pack_params(raw, cfg)


# --------------------------- pure-JAX reference -------------------------------
def _reference_probs(h, params, cfg=CFG):
    """Distribution computed with plain jnp from the same packed params."""
    S, K = cfg["stochastic_dim"], cfg["discrete_dim"]
    H = cfg["dynamics_predictor"]["hidden_dim"]
    unimix = cfg["unimix"]
    vecs = params["vecs"]

    def block(x, w, b, g, be):
        y = jnp.dot(x.astype(jnp.bfloat16), w,
                    preferred_element_type=jnp.float32) + b
        mu = jnp.mean(y, -1, keepdims=True)
        var = jnp.maximum(jnp.mean(y * y, -1, keepdims=True) - mu * mu, 0.0)
        y = (y - mu) * jax.lax.rsqrt(var + LN_EPS) * g + be
        return y * jax.nn.sigmoid(y)

    x = block(h, params["w1"], vecs[0, :H], vecs[1, :H], vecs[2, :H])
    x = block(x, params["w2"], vecs[3, :H], vecs[4, :H], vecs[5, :H])
    logits = jnp.dot(x.astype(jnp.bfloat16), params["wo"],
                     preferred_element_type=jnp.float32) + vecs[6]
    sm = jax.nn.softmax(logits.reshape(-1, S, K), axis=-1)
    return (1.0 - unimix) * sm + unimix / K


# --------------------------------- main ---------------------------------------
if __name__ == "__main__":
    key = jax.random.PRNGKey(0)
    k_param, k_h, k_sample = jax.random.split(key, 3)

    B = 2
    h = jax.random.normal(k_h, (B, CFG["recurrent_dim"]), jnp.float32)
    params = init_params(k_param)

    probs, stoch = dynamics_predictor_forward(h, params, k_sample)
    jax.block_until_ready((probs, stoch))

    S, K = CFG["stochastic_dim"], CFG["discrete_dim"]
    assert probs.shape == (B, S, K) and probs.dtype == jnp.float32
    assert stoch.shape == (B, S * K)
    assert jnp.allclose(jnp.sum(probs, axis=-1), 1.0, atol=1e-4)
    assert bool(jnp.all(probs > 0.0))

    onehot = stoch.reshape(B, S, K).astype(jnp.float32)
    assert bool(jnp.all((onehot == 0.0) | (onehot == 1.0)))
    assert jnp.allclose(jnp.sum(onehot, axis=-1), 1.0)

    # Distribution parity vs. a pure-JAX reference using the same packed params.
    probs_ref = _reference_probs(h, params)
    assert jnp.allclose(probs, probs_ref, atol=2e-4, rtol=2e-3)

    print("KERNEL_OK")
</pallas_src>

<mosaic_0001>
module attributes {stable_mosaic.version = 11 : i64} {
  func.func @_dyn_kernel(%arg0: i32, %arg1: memref<16x32xf32, #tpu.memory_space<vmem>>, %arg2: memref<16x8xf32, #tpu.memory_space<vmem>>, %arg3: memref<32x64xbf16, #tpu.memory_space<vmem>>, %arg4: memref<64x64xbf16, #tpu.memory_space<vmem>>, %arg5: memref<64x128xbf16, #tpu.memory_space<vmem>>, %arg6: memref<16x128xf32, #tpu.memory_space<vmem>>, %arg7: memref<128x256xf32, #tpu.memory_space<vmem>>, %arg8: memref<8x128xf32, #tpu.memory_space<vmem>>, %arg9: memref<16x128xf32, #tpu.memory_space<vmem>>, %arg10: memref<16x128xbf16, #tpu.memory_space<vmem>>) attributes {dimension_semantics = [#tpu.dimension_semantics<parallel>], iteration_bounds = array<i64: 1>, scalar_prefetch = 0 : i64, scratch_operands = 0 : i64, tpu.core_type = #tpu.core_type<tc>, window_params = [{transform_indices = @transform_0, window_bounds = array<i64: 16, 32>}, {transform_indices = @transform_1, window_bounds = array<i64: 16, 8>}, {pipeline_mode = #tpu.pipeline_mode<synchronous>, transform_indices = @transform_2, window_bounds = array<i64: 32, 64>}, {pipeline_mode = #tpu.pipeline_mode<synchronous>, transform_indices = @transform_3, window_bounds = array<i64: 64, 64>}, {pipeline_mode = #tpu.pipeline_mode<synchronous>, transform_indices = @transform_4, window_bounds = array<i64: 64, 128>}, {pipeline_mode = #tpu.pipeline_mode<synchronous>, transform_indices = @transform_5, window_bounds = array<i64: 16, 128>}, {pipeline_mode = #tpu.pipeline_mode<synchronous>, transform_indices = @transform_6, window_bounds = array<i64: 128, 256>}, {pipeline_mode = #tpu.pipeline_mode<synchronous>, transform_indices = @transform_7, window_bounds = array<i64: 8, 128>}, {transform_indices = @transform_8, window_bounds = array<i64: 16, 128>}, {transform_indices = @transform_9, window_bounds = array<i64: 16, 128>}]} {
    %c0 = arith.constant 0 : index
    %c0_0 = arith.constant 0 : index
    %0 = vector.load %arg6[%c0, %c0_0] : memref<16x128xf32, #tpu.memory_space<vmem>>, vector<16x128xf32>
    %1 = vector.extract_strided_slice %0 {offsets = [0, 0], sizes = [1, 64], strides = [1, 1]} : vector<16x128xf32> to vector<1x64xf32>
    %2 = vector.extract_strided_slice %0 {offsets = [1, 0], sizes = [1, 64], strides = [1, 1]} : vector<16x128xf32> to vector<1x64xf32>
    %3 = vector.extract_strided_slice %0 {offsets = [2, 0], sizes = [1, 64], strides = [1, 1]} : vector<16x128xf32> to vector<1x64xf32>
    %4 = vector.extract_strided_slice %0 {offsets = [3, 0], sizes = [1, 64], strides = [1, 1]} : vector<16x128xf32> to vector<1x64xf32>
    %5 = vector.extract_strided_slice %0 {offsets = [4, 0], sizes = [1, 64], strides = [1, 1]} : vector<16x128xf32> to vector<1x64xf32>
    %6 = vector.extract_strided_slice %0 {offsets = [5, 0], sizes = [1, 64], strides = [1, 1]} : vector<16x128xf32> to vector<1x64xf32>
    %7 = vector.extract_strided_slice %0 {offsets = [6, 0], sizes = [1, 128], strides = [1, 1]} : vector<16x128xf32> to vector<1x128xf32>
    %8 = vector.extract_strided_slice %0 {offsets = [7, 0], sizes = [1, 128], strides = [1, 1]} : vector<16x128xf32> to vector<1x128xf32>
    %9 = vector.extract_strided_slice %0 {offsets = [8, 0], sizes = [1, 128], strides = [1, 1]} : vector<16x128xf32> to vector<1x128xf32>
    %10 = vector.extract_strided_slice %0 {offsets = [9, 0], sizes = [1, 128], strides = [1, 1]} : vector<16x128xf32> to vector<1x128xf32>
    %c0_1 = arith.constant 0 : index
    %c0_2 = arith.constant 0 : index
    %11 = vector.load %arg1[%c0_1, %c0_2] : memref<16x32xf32, #tpu.memory_space<vmem>>, vector<16x32xf32>
    %12 = arith.truncf %11 : vector<16x32xf32> to vector<16x32xbf16>
    %c0_3 = arith.constant 0 : index
    %c0_4 = arith.constant 0 : index
    %13 = vector.load %arg3[%c0_3, %c0_4] : memref<32x64xbf16, #tpu.memory_space<vmem>>, vector<32x64xbf16>
    %cst = arith.constant dense<0.000000e+00> : vector<16x64xf32>
    %14 = tpu.matmul %12, %13, %cst {dimension_numbers = #tpu.dot_dimension_numbers<[1], [0], [0], [1], [0, 0, 1, 1], [], []>} : vector<16x32xbf16>, vector<32x64xbf16>, vector<16x64xf32> -> vector<16x64xf32>
    %15 = vector.broadcast %1 : vector<1x64xf32> to vector<16x64xf32>
    %16 = arith.addf %14, %15 : vector<16x64xf32>
    %cst_5 = arith.constant dense<0.000000e+00> : vector<16xf32>
    %17 = vector.multi_reduction <add>, %16, %cst_5 [1] : vector<16x64xf32> to vector<16xf32>
    %18 = vector.shape_cast %17 : vector<16xf32> to vector<16x1xf32>
    %cst_6 = arith.constant 6.400000e+01 : f32
    %19 = vector.broadcast %cst_6 : f32 to vector<16x1xf32>
    %20 = arith.divf %18, %19 : vector<16x1xf32>
    %21 = arith.mulf %16, %16 : vector<16x64xf32>
    %cst_7 = arith.constant dense<0.000000e+00> : vector<16xf32>
    %22 = vector.multi_reduction <add>, %21, %cst_7 [1] : vector<16x64xf32> to vector<16xf32>
    %23 = vector.shape_cast %22 : vector<16xf32> to vector<16x1xf32>
    %cst_8 = arith.constant 6.400000e+01 : f32
    %24 = vector.broadcast %cst_8 : f32 to vector<16x1xf32>
    %25 = arith.divf %23, %24 : vector<16x1xf32>
    %26 = arith.mulf %20, %20 : vector<16x1xf32>
    %27 = arith.subf %25, %26 : vector<16x1xf32>
    %cst_9 = arith.constant 0.000000e+00 : f32
    %28 = vector.broadcast %cst_9 : f32 to vector<16x1xf32>
    %29 = arith.maximumf %27, %28 : vector<16x1xf32>
    %30 = vector.broadcast %20 : vector<16x1xf32> to vector<16x64xf32>
    %31 = arith.subf %16, %30 : vector<16x64xf32>
    %cst_10 = arith.constant 9.99999974E-6 : f32
    %32 = vector.broadcast %cst_10 : f32 to vector<16x1xf32>
    %33 = arith.addf %29, %32 : vector<16x1xf32>
    %34 = math.rsqrt %33 : vector<16x1xf32>
    %35 = vector.broadcast %34 : vector<16x1xf32> to vector<16x64xf32>
    %36 = arith.mulf %31, %35 : vector<16x64xf32>
    %37 = vector.broadcast %2 : vector<1x64xf32> to vector<16x64xf32>
    %38 = arith.mulf %36, %37 : vector<16x64xf32>
    %39 = vector.broadcast %3 : vector<1x64xf32> to vector<16x64xf32>
    %40 = arith.addf %38, %39 : vector<16x64xf32>
    %41 = arith.negf %40 : vector<16x64xf32>
    %42 = math.exp %41 : vector<16x64xf32>
    %cst_11 = arith.constant 1.000000e+00 : f32
    %43 = vector.broadcast %cst_11 : f32 to vector<16x64xf32>
    %44 = arith.addf %43, %42 : vector<16x64xf32>
    %45 = arith.divf %43, %44 : vector<16x64xf32>
    %46 = arith.mulf %40, %45 : vector<16x64xf32>
    %47 = arith.truncf %46 : vector<16x64xf32> to vector<16x64xbf16>
    %c0_12 = arith.constant 0 : index
    %c0_13 = arith.constant 0 : index
    %48 = vector.load %arg4[%c0_12, %c0_13] : memref<64x64xbf16, #tpu.memory_space<vmem>>, vector<64x64xbf16>
    %cst_14 = arith.constant dense<0.000000e+00> : vector<16x64xf32>
    %49 = tpu.matmul %47, %48, %cst_14 {dimension_numbers = #tpu.dot_dimension_numbers<[1], [0], [0], [1], [0, 0, 1, 1], [], []>} : vector<16x64xbf16>, vector<64x64xbf16>, vector<16x64xf32> -> vector<16x64xf32>
    %50 = vector.broadcast %4 : vector<1x64xf32> to vector<16x64xf32>
    %51 = arith.addf %49, %50 : vector<16x64xf32>
    %cst_15 = arith.constant dense<0.000000e+00> : vector<16xf32>
    %52 = vector.multi_reduction <add>, %51, %cst_15 [1] : vector<16x64xf32> to vector<16xf32>
    %53 = vector.shape_cast %52 : vector<16xf32> to vector<16x1xf32>
    %cst_16 = arith.constant 6.400000e+01 : f32
    %54 = vector.broadcast %cst_16 : f32 to vector<16x1xf32>
    %55 = arith.divf %53, %54 : vector<16x1xf32>
    %56 = arith.mulf %51, %51 : vector<16x64xf32>
    %cst_17 = arith.constant dense<0.000000e+00> : vector<16xf32>
    %57 = vector.multi_reduction <add>, %56, %cst_17 [1] : vector<16x64xf32> to vector<16xf32>
    %58 = vector.shape_cast %57 : vector<16xf32> to vector<16x1xf32>
    %cst_18 = arith.constant 6.400000e+01 : f32
    %59 = vector.broadcast %cst_18 : f32 to vector<16x1xf32>
    %60 = arith.divf %58, %59 : vector<16x1xf32>
    %61 = arith.mulf %55, %55 : vector<16x1xf32>
    %62 = arith.subf %60, %61 : vector<16x1xf32>
    %cst_19 = arith.constant 0.000000e+00 : f32
    %63 = vector.broadcast %cst_19 : f32 to vector<16x1xf32>
    %64 = arith.maximumf %62, %63 : vector<16x1xf32>
    %65 = vector.broadcast %55 : vector<16x1xf32> to vector<16x64xf32>
    %66 = arith.subf %51, %65 : vector<16x64xf32>
    %cst_20 = arith.constant 9.99999974E-6 : f32
    %67 = vector.broadcast %cst_20 : f32 to vector<16x1xf32>
    %68 = arith.addf %64, %67 : vector<16x1xf32>
    %69 = math.rsqrt %68 : vector<16x1xf32>
    %70 = vector.broadcast %69 : vector<16x1xf32> to vector<16x64xf32>
    %71 = arith.mulf %66, %70 : vector<16x64xf32>
    %72 = vector.broadcast %5 : vector<1x64xf32> to vector<16x64xf32>
    %73 = arith.mulf %71, %72 : vector<16x64xf32>
    %74 = vector.broadcast %6 : vector<1x64xf32> to vector<16x64xf32>
    %75 = arith.addf %73, %74 : vector<16x64xf32>
    %76 = arith.negf %75 : vector<16x64xf32>
    %77 = math.exp %76 : vector<16x64xf32>
    %cst_21 = arith.constant 1.000000e+00 : f32
    %78 = vector.broadcast %cst_21 : f32 to vector<16x64xf32>
    %79 = arith.addf %78, %77 : vector<16x64xf32>
    %80 = arith.divf %78, %79 : vector<16x64xf32>
    %81 = arith.mulf %75, %80 : vector<16x64xf32>
    %82 = arith.truncf %81 : vector<16x64xf32> to vector<16x64xbf16>
    %c0_22 = arith.constant 0 : index
    %c0_23 = arith.constant 0 : index
    %83 = vector.load %arg5[%c0_22, %c0_23] : memref<64x128xbf16, #tpu.memory_space<vmem>>, vector<64x128xbf16>
    %cst_24 = arith.constant dense<0.000000e+00> : vector<16x128xf32>
    %84 = tpu.matmul %82, %83, %cst_24 {dimension_numbers = #tpu.dot_dimension_numbers<[1], [0], [0], [1], [0, 0, 1, 1], [], []>} : vector<16x64xbf16>, vector<64x128xbf16>, vector<16x128xf32> -> vector<16x128xf32>
    %85 = vector.broadcast %7 : vector<1x128xf32> to vector<16x128xf32>
    %86 = arith.addf %84, %85 : vector<16x128xf32>
    %cst_25 = arith.constant dense<0xFF800000> : vector<16xf32>
    %87 = vector.multi_reduction <maximumf>, %86, %cst_25 [1] : vector<16x128xf32> to vector<16xf32>
    %88 = vector.shape_cast %87 : vector<16xf32> to vector<16x1xf32>
    %89 = vector.broadcast %88 : vector<16x1xf32> to vector<16x128xf32>
    %90 = arith.subf %86, %89 : vector<16x128xf32>
    %cst_26 = arith.constant -8.500000e+01 : f32
    %91 = vector.broadcast %cst_26 : f32 to vector<16x128xf32>
    %92 = arith.maximumf %90, %91 : vector<16x128xf32>
    %93 = math.exp %92 : vector<16x128xf32>
    %c0_27 = arith.constant 0 : index
    %c0_28 = arith.constant 0 : index
    %94 = vector.load %arg7[%c0_27, %c0_28] : memref<128x256xf32, #tpu.memory_space<vmem>>, vector<128x256xf32>
    %cst_29 = arith.constant dense<0.000000e+00> : vector<16x256xf32>
    %95 = tpu.matmul %93, %94, %cst_29 {dimension_numbers = #tpu.dot_dimension_numbers<[1], [0], [0], [1], [0, 0, 1, 1], [], []>} : vector<16x128xf32>, vector<128x256xf32>, vector<16x256xf32> -> vector<16x256xf32>
    %96 = vector.extract_strided_slice %95 {offsets = [0, 0], sizes = [16, 128], strides = [1, 1]} : vector<16x256xf32> to vector<16x128xf32>
    %97 = vector.extract_strided_slice %95 {offsets = [0, 128], sizes = [16, 128], strides = [1, 1]} : vector<16x256xf32> to vector<16x128xf32>
    %98 = tpu.reciprocal %96 {approx = true} : vector<16x128xf32> -> vector<16x128xf32>
    %99 = arith.mulf %96, %98 : vector<16x128xf32>
    %cst_30 = arith.constant 2.000000e+00 : f32
    %100 = vector.broadcast %cst_30 : f32 to vector<16x128xf32>
    %101 = arith.subf %100, %99 : vector<16x128xf32>
    %102 = arith.mulf %98, %101 : vector<16x128xf32>
    %cst_31 = arith.constant 9.900000e-01 : f32
    %103 = vector.broadcast %cst_31 : f32 to vector<16x128xf32>
    %104 = arith.mulf %103, %102 : vector<16x128xf32>
    %105 = arith.mulf %93, %104 : vector<16x128xf32>
    %cst_32 = arith.constant 6.250000e-04 : f32
    %106 = vector.broadcast %cst_32 : f32 to vector<16x128xf32>
    %107 = arith.addf %105, %106 : vector<16x128xf32>
    %c0_33 = arith.constant 0 : index
    %c0_34 = arith.constant 0 : index
    %108 = vector.load %arg9[%c0_33, %c0_34] : memref<16x128xf32, #tpu.memory_space<vmem>>, vector<16x128xf32>
    tpu.vector_store %arg9[%c0_33, %c0_34], %107 {strides = array<i32>} : memref<16x128xf32, #tpu.memory_space<vmem>>, vector<16x128xf32>,
    %109 = arith.mulf %97, %104 : vector<16x128xf32>
    %110 = vector.broadcast %8 : vector<1x128xf32> to vector<16x128xf32>
    %111 = arith.addf %109, %110 : vector<16x128xf32>
    %c0_35 = arith.constant 0 : index
    %c0_36 = arith.constant 0 : index
    %112 = vector.load %arg2[%c0_35, %c0_36] : memref<16x8xf32, #tpu.memory_space<vmem>>, vector<16x8xf32>
    %c0_37 = arith.constant 0 : index
    %c0_38 = arith.constant 0 : index
    %113 = vector.load %arg8[%c0_37, %c0_38] : memref<8x128xf32, #tpu.memory_space<vmem>>, vector<8x128xf32>
    %cst_39 = arith.constant dense<0.000000e+00> : vector<16x128xf32>
    %114 = tpu.matmul %112, %113, %cst_39 {dimension_numbers = #tpu.dot_dimension_numbers<[1], [0], [0], [1], [0, 0, 1, 1], [], []>} : vector<16x8xf32>, vector<8x128xf32>, vector<16x128xf32> -> vector<16x128xf32>
    %115 = vector.broadcast %9 : vector<1x128xf32> to vector<16x128xf32>
    %116 = arith.addf %111, %115 : vector<16x128xf32>
    %117 = arith.cmpf oge, %114, %116 : vector<16x128xf32>
    %118 = arith.extui %117 : vector<16x128xi1> to vector<16x128xi32>
    %119 = arith.sitofp %118 : vector<16x128xi32> to vector<16x128xf32>
    %120 = vector.extract_strided_slice %94 {offsets = [0, 0], sizes = [128, 128], strides = [1, 1]} : vector<128x256xf32> to vector<128x128xf32>
    %cst_40 = arith.constant dense<0.000000e+00> : vector<16x128xf32>
    %121 = tpu.matmul %119, %120, %cst_40 {dimension_numbers = #tpu.dot_dimension_numbers<[1], [0], [0], [1], [0, 0, 1, 1], [], []>} : vector<16x128xf32>, vector<128x128xf32>, vector<16x128xf32> -> vector<16x128xf32>
    %122 = vector.broadcast %10 : vector<1x128xf32> to vector<16x128xf32>
    %123 = arith.subf %122, %121 : vector<16x128xf32>
    %124 = math.absf %123 : vector<16x128xf32>
    %cst_41 = arith.constant 5.000000e-01 : f32
    %125 = vector.broadcast %cst_41 : f32 to vector<16x128xf32>
    %126 = arith.cmpf olt, %124, %125 : vector<16x128xf32>
    %127 = arith.extui %126 : vector<16x128xi1> to vector<16x128xi32>
    %128 = arith.sitofp %127 : vector<16x128xi32> to vector<16x128xf32>
    %129 = arith.truncf %128 : vector<16x128xf32> to vector<16x128xbf16>
    %c0_42 = arith.constant 0 : index
    %c0_43 = arith.constant 0 : index
    %130 = vector.load %arg10[%c0_42, %c0_43] : memref<16x128xbf16, #tpu.memory_space<vmem>>, vector<16x128xbf16>
    tpu.vector_store %arg10[%c0_42, %c0_43], %129 {strides = array<i32>} : memref<16x128xbf16, #tpu.memory_space<vmem>>, vector<16x128xbf16>,
    return
  }
  func.func @transform_0(%arg0: i32) -> (i32, i32) {
    %c0_i32 = arith.constant 0 : i32
    %c0_i32_0 = arith.constant 0 : i32
    return %arg0, %c0_i32 : i32, i32
  }
  func.func @transform_1(%arg0: i32) -> (i32, i32) {
    %c0_i32 = arith.constant 0 : i32
    %c0_i32_0 = arith.constant 0 : i32
    return %arg0, %c0_i32 : i32, i32
  }
  func.func @transform_2(%arg0: i32) -> (i32, i32) {
    %c0_i32 = arith.constant 0 : i32
    %c0_i32_0 = arith.constant 0 : i32
    %c0_i32_1 = arith.constant 0 : i32
    return %c0_i32, %c0_i32_0 : i32, i32
  }
  func.func @transform_3(%arg0: i32) -> (i32, i32) {
    %c0_i32 = arith.constant 0 : i32
    %c0_i32_0 = arith.constant 0 : i32
    %c0_i32_1 = arith.constant 0 : i32
    return %c0_i32, %c0_i32_0 : i32, i32
  }
  func.func @transform_4(%arg0: i32) -> (i32, i32) {
    %c0_i32 = arith.constant 0 : i32
    %c0_i32_0 = arith.constant 0 : i32
    %c0_i32_1 = arith.constant 0 : i32
    return %c0_i32, %c0_i32_0 : i32, i32
  }
  func.func @transform_5(%arg0: i32) -> (i32, i32) {
    %c0_i32 = arith.constant 0 : i32
    %c0_i32_0 = arith.constant 0 : i32
    %c0_i32_1 = arith.constant 0 : i32
    return %c0_i32, %c0_i32_0 : i32, i32
  }
  func.func @transform_6(%arg0: i32) -> (i32, i32) {
    %c0_i32 = arith.constant 0 : i32
    %c0_i32_0 = arith.constant 0 : i32
    %c0_i32_1 = arith.constant 0 : i32
    return %c0_i32, %c0_i32_0 : i32, i32
  }
  func.func @transform_7(%arg0: i32) -> (i32, i32) {
    %c0_i32 = arith.constant 0 : i32
    %c0_i32_0 = arith.constant 0 : i32
    %c0_i32_1 = arith.constant 0 : i32
    return %c0_i32, %c0_i32_0 : i32, i32
  }
  func.func @transform_8(%arg0: i32) -> (i32, i32) {
    %c0_i32 = arith.constant 0 : i32
    %c0_i32_0 = arith.constant 0 : i32
    return %arg0, %c0_i32 : i32, i32
  }
  func.func @transform_9(%arg0: i32) -> (i32, i32) {
    %c0_i32 = arith.constant 0 : i32
    %c0_i32_0 = arith.constant 0 : i32
    return %arg0, %c0_i32 : i32, i32
  }
}

</mosaic_0001>

<bundles_post_ra>
// kernel: tpu_custom_call.1
= control target key start
LH: loop header
LB: loop body
LE: loop exit
PB: predicated region body
PF: predicated region fallthrough
CT: control target
= control target key end

     0   :  { %15 = vsyncpa [#allocation3], 0  ;;  %s1142_s0 = inlined_call_operand.vmem [shape: f32[16,32], index: 0, kind: input, shape index: {}]   ;;  %s1143_s1 = inlined_call_operand.vmem [shape: f32[16,8], index: 1, kind: input, shape index: {}]   ;;  %s1144_s2 = inlined_call_operand.hbm [shape: bf16[32,64], index: 2, kind: input, shape index: {}]   ;;  %s1145_s3 = inlined_call_operand.hbm [shape: bf16[64,64], index: 3, kind: input, shape index: {}]   ;;  %s1146_s4 = inlined_call_operand.hbm [shape: bf16[64,128], index: 4, kind: input, shape index: {}]   ;;  %s1147_s5 = inlined_call_operand.hbm [shape: f32[16,128], index: 5, kind: input, shape index: {}]   ;;  %s1148_s6 = inlined_call_operand.hbm [shape: f32[128,256], index: 6, kind: input, shape index: {}]   ;;  %s1149_s7 = inlined_call_operand.vmem [shape: f32[8,128], index: 7, kind: input, shape index: {}]   ;;  %s1150_s8 = inlined_call_operand.hbm [shape: f32[16,128], index: 8, kind: output, shape index: {0}]   ;;  %s1151_s9 = inlined_call_operand.hbm [shape: bf16[16,128], index: 9, kind: output, shape index: {1}]  }
   0x1   :  { %16 = vsyncpa [#allocation6], 0 }
   0x2   :  { %17 = vsyncpa [#allocation9], 0 }
   0x3   :  { %18 = vsyncpa [#allocation4], 0 }
   0x4   :  { %19 = vsyncpa [#allocation13], 0  ;;  %s41_s11 = sshll.u32 %s1145_s3, 4  ;;  %s980_s12 = smov [#allocation5]   ;;  %s42_s11 = int_to_ptr.hbm [resolvable:$true] %s41_s11 }
   0x5   :  { %s43_s13 = sshll.u32 %s980_s12, 4  ;;  %s67_s16 = sshll.u32 %s1147_s5, 4  ;;  %s44_s13 = int_to_ptr.vmem [resolvable:$true] %s43_s13  ;;  %s68_s16 = int_to_ptr.hbm [resolvable:$true] %s67_s16 }
   0x6   :  { %s981_s17 = smov 64   ;;  %s982_s18 = smov 4  }
   0x7   :  { %49 = dma.hbm_to_vmem [thread:$0]  %s42_s11, 512, %s44_s13, [#allocation6], %s981_s17, %s981_s17, %s982_s18  }
   0x8   :  { %s983_s19 = smov [#allocation8]   ;;  %s984_s21 = smov 128  }
   0x9   :  { %s69_s20 = sshll.u32 %s983_s19, 4  ;;  %s985_s3 = smov 8   ;;  %s70_s20 = int_to_ptr.vmem [resolvable:$true] %s69_s20 }
   0xa   :  { %75 = dma.hbm_to_vmem [thread:$0]  %s68_s16, 256, %s70_s20, [#allocation9], %s984_s21, %s984_s21, %s985_s3  }
   0xb   :  { %s28_s5 = sshll.u32 %s1144_s2, 4  ;;  %s986_s24 = smov [#allocation2]   ;;  %s29_s5 = int_to_ptr.hbm [resolvable:$true] %s28_s5 }
   0xc   :  { %s30_s25 = sshll.u32 %s986_s24, 4  ;;  %s54_s28 = sshll.u32 %s1146_s4, 4  ;;  %s31_s25 = int_to_ptr.vmem [resolvable:$true] %s30_s25  ;;  %s55_s28 = int_to_ptr.hbm [resolvable:$true] %s54_s28 }
   0xd   :  { %36 = dma.hbm_to_vmem [thread:$0]  %s29_s5, 256, %s31_s25, [#allocation3], %s981_s17, %s981_s17, %s982_s18  }
   0xe   :  { %s987_s29 = smov [#allocation7]   ;;  %s80_s12 = sshll.u32 %s1148_s6, 4  ;;  %s81_s12 = int_to_ptr.hbm [resolvable:$true] %s80_s12 }
   0xf   :  { %s56_s30 = sshll.u32 %s987_s29, 4  ;;  %s988_s2 = smov [#allocation10]   ;;  %s57_s30 = int_to_ptr.vmem [resolvable:$true] %s56_s30 }
  0x10   :  { %62 = dma.hbm_to_vmem [thread:$0]  %s55_s28, 512, %s57_s30, [#allocation6], %s981_s17, %s981_s17, %s982_s18  }
  0x11   :  { %s82_s13 = sshll.u32 %s988_s2, 4  ;;  %s989_s4 = smov 256   ;;  %s83_s13 = int_to_ptr.vmem [resolvable:$true] %s82_s13 }
  0x12   :  { %s990_s14 = smov 16  }
  0x13   :  { %88 = dma.hbm_to_vmem [thread:$0]  %s81_s12, 4096, %s83_s13, [#allocation9], %s989_s4, %s989_s4, %s990_s14  }
  0x14   :  { %970 = dma.done.wait [#allocation3], 256  }
  0x15   :  { %971 = vsyncadd [#allocation3], 4294967040 }
  0x16   :  { %972 = dma.done.wait [#allocation6], 1024  }
  0x17   :  { %973 = vsyncadd [#allocation6], 4294966272 }
  0x18   :  { %974 = dma.done.wait [#allocation9], 4352  }
  0x19   :  { %975 = vsyncadd [#allocation9], 4294962944  ;;  %v740_v0 = vld [vmem:[#allocation2 + $0x8] sm:$0xff]  ;;  %v739_v1 = vld [vmem:[#allocation2] sm:$0xff]  ;;  %vm134_vm0 = vcmask 261120   ;;  %vm152_vm1 = vcmask 523264  }
  0x1a   :  { %144 = vmatpush.bf16.msra.mxu0 %v740_v0  ;;  %v114_v2 = vld [vmem:[%s1142_s0] sm:$0xff]  ;;  %v115_v3 = vld [vmem:[%s1142_s0 + $0x8] sm:$0xff]  ;;  %v1079_v5 = vld [vmem:[#allocation8] sm:$0xff]  ;;  %v991_v17 = vmov 64.0   ;;  %s651_s27 = sshll.u32 %s1150_s8, 4  ;;  %s994_s28 = smov [#allocation12]   ;;  %s652_s27 = int_to_ptr.hbm [resolvable:$true] %s651_s27 }
  0x1b   :  { %v116_v4 = vpack.c.bf16 %v115_v3, %v114_v2  ;;  %v121_v6 = vperm.slane %v1079_v5, 0  ;;  %768 = vrcp.f32 %v991_v17  ;;  %v744_v30 = vld [vmem:[#allocation5 + $0x18] sm:$0xff]  ;;  %v743_v32 = vld [vmem:[#allocation5 + $0x10] sm:$0xff]  ;;  %v742_v38 = vld [vmem:[#allocation5 + $0x8] sm:$0xff]  ;;  %v210_v53 = vperm.slane %v1079_v5, 1  ;;  %s662_s29 = sshll.u32 %s994_s28, 4  ;;  %s663_s29 = int_to_ptr.vmem [resolvable:$true] %s662_s29 }
  0x1c   :  { %297 = vmatpush.bf16.msra.mxu1 %v744_v30  ;;  %v741_v41 = vld [vmem:[#allocation5] sm:$0xff]  ;;  %v213_v57 = vperm.slane %v1079_v5, 2  ;;  %s664_s8 = sshll.u32 %s1151_s9, 4  ;;  %s665_s8 = int_to_ptr.hbm [resolvable:$true] %s664_s8 }
  0x1e   :  { %145 = vmatpush.bf16.msra.mxu0 %v739_v1 }
  0x20   :  { %298 = vmatpush.bf16.msra.mxu1 %v743_v32 }
  0x21   :  { %692 = vmatmul.msk.bf16.vlgmr.msra.gmra.mxu0 %vm134_vm0, %v116_v4  ;;  %v769_v18 = vpop.eup %768 }
  0x22   :  { %v160_v19 = vmul.f32 64.0, %v769_v18  ;;  %vm164_vm2 = vweird.f32 %v769_v18 }
  0x24   :  { %v161_v20 = vsub.f32 1.0, %v160_v19  ;;  %299 = vmatpush.bf16.msra.mxu1 %v742_v38 }
  0x26   :  { %v162_v21 = vmul.f32 %v769_v18, %v161_v20 }
  0x28   :  { %v163_v22 = vadd.f32 %v769_v18, %v162_v21  ;;  %300 = vmatpush.bf16.msra.mxu1 %v741_v41 }
  0x2a   :  { %v1096_v23 = vsel %vm164_vm2, %v769_v18, %v163_v22 }
  0x9e   :  { %v147_v7 = vpop.f32.mrf.mxu0 }
  0x9f   :  { %v1082_v8 = vadd.f32 %v147_v7, %v121_v6 }
  0xa1   :  { %v153_v9 = vsel %vm152_vm1, %v1082_v8, 0.0  ;;  %v168_v10 = vmul.f32 %v1082_v8, %v1082_v8 }
  0xa2   :  { %154 = vadd.xlane.f32.xlu0 %v153_v9 }
  0xa3   :  { %v170_v11 = vsel %vm152_vm1, %v168_v10, 0.0 }
  0xa4   :  { %171 = vadd.xlane.f32.xlu1 %v170_v11 }
  0xa6   :  { %v149_v12 = vpop.f32.mrf.mxu0 }
  0xa7   :  { %v1089_v13 = vadd.f32 %v149_v12, %v121_v6 }
  0xa9   :  { %v156_v14 = vsel %vm152_vm1, %v1089_v13, 0.0  ;;  %v169_v15 = vmul.f32 %v1089_v13, %v1089_v13 }
  0xaa   :  { %157 = vadd.xlane.f32.xlu0 %v156_v14 }
  0xab   :  { %v173_v16 = vsel %vm152_vm1, %v169_v15, 0.0 }
  0xac   :  { %174 = vadd.xlane.f32.xlu1 %v173_v16 }
 0x115   :  { %v155_v24 = vpop.xlane.xlu0 %154 }
 0x116   :  { %v166_v25 = vmul.f32 %v1096_v23, %v155_v24 }
 0x117   :  { %v172_v26 = vpop.xlane.xlu1 %171 }
 0x118   :  { %v178_v27 = vmul.f32 %v166_v25, %v166_v25  ;;  %v176_v28 = vmul.f32 %v172_v26, %v1096_v23  ;;  %v184_v51 = vsub.f32 %v1082_v8, %v166_v25 }
 0x11a   :  { %v180_v29 = vsub.f32 %v176_v28, %v178_v27 }
 0x11c   :  { %v182_v31 = vmax.f32 %v180_v29, 0.0 }
 0x11d   :  { %v158_v33 = vpop.xlane.xlu0 %157 }
 0x11e   :  { %v186_v34 = vadd.f32 1e-05, %v182_v31  ;;  %v167_v35 = vmul.f32 %v1096_v23, %v158_v33 }
 0x11f   :  { %v175_v36 = vpop.xlane.xlu1 %174 }
 0x120   :  { %770 = vrsqrt.f32 %v186_v34  ;;  %v179_v37 = vmul.f32 %v167_v35, %v167_v35  ;;  %v177_v39 = vmul.f32 %v175_v36, %v1096_v23  ;;  %vm194_vm4 = vweird.f32 %v186_v34 }
 0x121   :  { %v185_v0 = vsub.f32 %v1089_v13, %v167_v35  ;;  %v265_v35 = vperm.slane %v1079_v5, 3 }
 0x122   :  { %v181_v40 = vsub.f32 %v177_v39, %v179_v37 }
 0x124   :  { %v183_v42 = vmax.f32 %v181_v40, 0.0 }
 0x126   :  { %v771_v43 = vpop.eup %770  ;;  %v187_v45 = vadd.f32 1e-05, %v183_v42 }
 0x127   :  { %v189_v44 = vmul.f32 %v771_v43, %v186_v34  ;;  %vm195_vm3 = vweird.f32 %v771_v43 }
 0x128   :  { %772 = vrsqrt.f32 %v187_v45  ;;  %vm196_vm5 = vmor %vm194_vm4, %vm195_vm3  ;;  %vm204_vm7 = vweird.f32 %v187_v45 }
 0x129   :  { %v190_v46 = vmul.f32 %v771_v43, %v189_v44 }
 0x12b   :  { %v191_v47 = vmul.f32 0.5, %v190_v46 }
 0x12d   :  { %v192_v48 = vsub.f32 1.5, %v191_v47 }
 0x12e   :  { %v773_v49 = vpop.eup %772 }
 0x12f   :  { %v193_v50 = vmul.f32 %v771_v43, %v192_v48  ;;  %v199_v52 = vmul.f32 %v773_v49, %v187_v45  ;;  %vm205_vm6 = vweird.f32 %v773_v49 }
 0x130   :  { %vm206_vm8 = vmor %vm204_vm7, %vm205_vm6 }
 0x131   :  { %v197_v54 = vsel %vm196_vm5, %v771_v43, %v193_v50  ;;  %v200_v55 = vmul.f32 %v773_v49, %v199_v52  ;;  %v748_v52 = vld [vmem:[#allocation7 + $0x18] sm:$0xff] }
 0x132   :  { %v208_v56 = vmul.f32 %v197_v54, %v184_v51  ;;  %444 = vmatpush.bf16.msra.mxu2 %v748_v52  ;;  %v747_v54 = vld [vmem:[#allocation7 + $0x10] sm:$0xff] }
 0x133   :  { %v201_v58 = vmul.f32 0.5, %v200_v55 }
 0x134   :  { %v211_v59 = vmul.f32 %v210_v53, %v208_v56 }
 0x135   :  { %v202_v60 = vsub.f32 1.5, %v201_v58 }
 0x136   :  { %v214_v61 = vadd.f32 %v213_v57, %v211_v59  ;;  %445 = vmatpush.bf16.msra.mxu2 %v747_v54 }
 0x137   :  { %v203_v62 = vmul.f32 %v773_v49, %v202_v60  ;;  %v746_v60 = vld [vmem:[#allocation7 + $0x8] sm:$0xff] }
 0x138   :  { %v693_v63 = vmul.f32 -1.442695, %v214_v61 }
 0x139   :  { %v207_v1 = vsel %vm206_vm8, %v773_v49, %v203_v62 }
 0x13a   :  { %774 = vpow2.f32 %v693_v63  ;;  %v209_v2 = vmul.f32 %v207_v1, %v185_v0  ;;  %446 = vmatpush.bf16.msra.mxu2 %v746_v60  ;;  %v745_v63 = vld [vmem:[#allocation7] sm:$0xff] }
 0x13b   :  { %v492_v60 = vld [vmem:[#allocation10 + $0xd0] sm:$0xff] }
 0x13c   :  { %v212_v3 = vmul.f32 %v210_v53, %v209_v2 }
 0x13e   :  { %v215_v4 = vadd.f32 %v213_v57, %v212_v3  ;;  %447 = vmatpush.bf16.msra.mxu2 %v745_v63  ;;  %v491_v63 = vld [vmem:[#allocation10 + $0xc8] sm:$0xff] }
 0x140   :  { %v775_v6 = vpop.eup %774  ;;  %v694_v7 = vmul.f32 -1.442695, %v215_v4 }
 0x141   :  { %v222_v8 = vadd.f32 1.0, %v775_v6 }
 0x142   :  { %776 = vpow2.f32 %v694_v7 }
 0x143   :  { %778 = vrcp.f32 %v222_v8  ;;  %v235_v18 = vand.u32 2147483648, %v222_v8  ;;  %vm229_vm10 = vweird.f32 %v222_v8  ;;  %v233_v19 = vand.u32 2147483647, %v222_v8 }
 0x145   :  { %v236_v26 = vor.u32 1.1754944e-38, %v235_v18  ;;  %vm234_vm13 = vcmp.eq.f32.partialorder %v233_v19, 8.507059e+37 }
 0x148   :  { %v777_v9 = vpop.eup %776 }
 0x149   :  { %v779_v10 = vpop.eup %778  ;;  %v223_v11 = vadd.f32 1.0, %v777_v9 }
 0x14a   :  { %v225_v12 = vmul.f32 %v779_v10, %v222_v8  ;;  %vm230_vm9 = vweird.f32 %v779_v10 }
 0x14b   :  { %780 = vrcp.f32 %v223_v11  ;;  %vm231_vm11 = vmor %vm229_vm10, %vm230_vm9  ;;  %v250_v21 = vand.u32 2147483648, %v223_v11  ;;  %v248_v25 = vand.u32 2147483647, %v223_v11  ;;  %vm244_vm14 = vweird.f32 %v223_v11 }
 0x14c   :  { %v226_v14 = vsub.f32 1.0, %v225_v12 }
 0x14d   :  { %v251_v29 = vor.u32 1.1754944e-38, %v250_v21  ;;  %vm249_vm0 = vcmp.eq.f32.partialorder %v248_v25, 8.507059e+37 }
 0x14e   :  { %v227_v15 = vmul.f32 %v779_v10, %v226_v14 }
 0x150   :  { %v228_v13 = vadd.f32 %v779_v10, %v227_v15 }
 0x151   :  { %v781_v16 = vpop.eup %780 }
 0x152   :  { %v240_v17 = vmul.f32 %v781_v16, %v223_v11  ;;  %v232_v22 = vsel %vm231_vm11, %v779_v10, %v228_v13  ;;  %vm245_vm12 = vweird.f32 %v781_v16 }
 0x153   :  { %v237_v28 = vsel %vm234_vm13, %v236_v26, %v232_v22  ;;  %vm246_vm15 = vmor %vm244_vm14, %vm245_vm12 }
 0x154   :  { %v241_v20 = vsub.f32 1.0, %v240_v17  ;;  %v254_v32 = vmul.f32 %v237_v28, %v214_v61 }
 0x156   :  { %v242_v24 = vmul.f32 %v781_v16, %v241_v20 }
 0x158   :  { %v243_v27 = vadd.f32 %v781_v16, %v242_v24 }
 0x15a   :  { %v247_v30 = vsel %vm246_vm15, %v781_v16, %v243_v27  ;;  %v360_v16 = vperm.slane %v1079_v5, 5 }
 0x15b   :  { %v252_v31 = vsel %vm249_vm0, %v251_v29, %v247_v30 }
 0x15c   :  { %v255_v33 = vmul.f32 %v252_v31, %v215_v4 }
 0x15e   :  { %v256_v34 = vpack.c.bf16 %v255_v33, %v254_v32 }
 0x160   :  { %711 = vmatmul.msk.bf16.vlgmr.msra.gmra.mxu1 %vm152_vm1, %v256_v34 }
 0x1dd   :  { %v302_v36 = vpop.f32.mrf.mxu1 }
 0x1de   :  { %v303_v37 = vadd.f32 %v302_v36, %v265_v35 }
 0x1e0   :  { %v307_v38 = vsel %vm152_vm1, %v303_v37, 0.0  ;;  %v315_v39 = vmul.f32 %v303_v37, %v303_v37 }
 0x1e1   :  { %308 = vadd.xlane.f32.xlu2 %v307_v38 }
 0x1e2   :  { %v317_v40 = vsel %vm152_vm1, %v315_v39, 0.0 }
 0x1e3   :  { %318 = vadd.xlane.f32.xlu0 %v317_v40 }
 0x1e5   :  { %v304_v41 = vpop.f32.mrf.mxu1 }
 0x1e6   :  { %v305_v42 = vadd.f32 %v304_v41, %v265_v35 }
 0x1e8   :  { %v310_v43 = vsel %vm152_vm1, %v305_v42, 0.0  ;;  %v316_v44 = vmul.f32 %v305_v42, %v305_v42 }
 0x1e9   :  { %311 = vadd.xlane.f32.xlu2 %v310_v43 }
 0x1ea   :  { %v320_v45 = vsel %vm152_vm1, %v316_v44, 0.0 }
 0x1eb   :  { %321 = vadd.xlane.f32.xlu1 %v320_v45 }
 0x254   :  { %v309_v46 = vpop.xlane.xlu2 %308 }
 0x255   :  { %v313_v47 = vmul.f32 %v309_v46, %v1096_v23 }
 0x256   :  { %v319_v48 = vpop.xlane.xlu0 %318 }
 0x257   :  { %v325_v49 = vmul.f32 %v313_v47, %v313_v47  ;;  %v323_v50 = vmul.f32 %v319_v48, %v1096_v23  ;;  %v331_v10 = vsub.f32 %v303_v37, %v313_v47 }
 0x259   :  { %v327_v51 = vsub.f32 %v323_v50, %v325_v49 }
 0x25b   :  { %v329_v53 = vmax.f32 %v327_v51, 0.0 }
 0x25c   :  { %v312_v55 = vpop.xlane.xlu2 %311 }
 0x25d   :  { %v333_v56 = vadd.f32 1e-05, %v329_v53  ;;  %v314_v57 = vmul.f32 %v312_v55, %v1096_v23 }
 0x25e   :  { %v322_v58 = vpop.xlane.xlu1 %321 }
 0x25f   :  { %782 = vrsqrt.f32 %v333_v56  ;;  %v326_v59 = vmul.f32 %v314_v57, %v314_v57  ;;  %v324_v61 = vmul.f32 %v322_v58, %v1096_v23  ;;  %vm341_vm3 = vweird.f32 %v333_v56  ;;  %v494_v58 = vld [vmem:[#allocation10 + $0xe0] sm:$0xff] }
 0x260   :  { %v357_v23 = vperm.slane %v1079_v5, 4  ;;  %v332_v22 = vsub.f32 %v305_v42, %v314_v57  ;;  %v497_v57 = vld [vmem:[#allocation10 + $0xf8] sm:$0xff] }
 0x261   :  { %v328_v62 = vsub.f32 %v324_v61, %v326_v59  ;;  %521 = vmatpush.msrb.mxu0 %v497_v57  ;;  %v495_v59 = vld [vmem:[#allocation10 + $0xe8] sm:$0xff]  ;;  %v493_v61 = vld [vmem:[#allocation10 + $0xd8] sm:$0xff] }
 0x263   :  { %v330_v0 = vmax.f32 %v328_v62, 0.0  ;;  %522 = vmatpush.msrb.mxu0 %v495_v59  ;;  %v490_v62 = vld [vmem:[#allocation10 + $0xc0] sm:$0xff] }
 0x265   :  { %v783_v1 = vpop.eup %782  ;;  %v334_v3 = vadd.f32 1e-05, %v330_v0  ;;  %523 = vmatpush.msrb.mxu0 %v493_v61  ;;  %v488_v0 = vld [vmem:[#allocation10 + $0xb0] sm:$0xff] }
 0x266   :  { %v336_v2 = vmul.f32 %v783_v1, %v333_v56  ;;  %vm342_vm2 = vweird.f32 %v783_v1  ;;  %v496_v56 = vld [vmem:[#allocation10 + $0xf0] sm:$0xff] }
 0x267   :  { %784 = vrsqrt.f32 %v334_v3  ;;  %vm343_vm4 = vmor %vm341_vm3, %vm342_vm2  ;;  %vm351_vm6 = vweird.f32 %v334_v3  ;;  %498 = vmatpush.msra.mxu3 %v496_v56  ;;  %607 = vmatpush.msrb.mxu2 %v496_v56 }
 0x268   :  { %v337_v4 = vmul.f32 %v783_v1, %v336_v2  ;;  %524 = vmatpush.msrb.mxu0 %v491_v63  ;;  %v486_v2 = vld [vmem:[#allocation10 + $0xa0] sm:$0xff] }
 0x269   :  { %499 = vmatpush.msra.mxu3 %v494_v58  ;;  %608 = vmatpush.msrb.mxu2 %v494_v58 }
 0x26a   :  { %v338_v6 = vmul.f32 0.5, %v337_v4  ;;  %v484_v4 = vld [vmem:[#allocation10 + $0x90] sm:$0xff] }
 0x26b   :  { %500 = vmatpush.msra.mxu3 %v492_v60  ;;  %609 = vmatpush.msrb.mxu2 %v492_v60 }
 0x26c   :  { %v339_v7 = vsub.f32 1.5, %v338_v6  ;;  %v485_v6 = vld [vmem:[#allocation10 + $0x98] sm:$0xff] }
 0x26d   :  { %v785_v8 = vpop.eup %784  ;;  %501 = vmatpush.msra.mxu3 %v490_v62  ;;  %610 = vmatpush.msrb.mxu2 %v490_v62 }
 0x26e   :  { %v340_v9 = vmul.f32 %v783_v1, %v339_v7  ;;  %v346_v11 = vmul.f32 %v785_v8, %v334_v3  ;;  %vm352_vm5 = vweird.f32 %v785_v8  ;;  %v487_v3 = vld [vmem:[#allocation10 + $0xa8] sm:$0xff]  ;;  %v482_v7 = vld [vmem:[#allocation10 + $0x80] sm:$0xff] }
 0x26f   :  { %vm353_vm7 = vmor %vm351_vm6, %vm352_vm5  ;;  %502 = vmatpush.msra.mxu3 %v488_v0  ;;  %611 = vmatpush.msrb.mxu2 %v488_v0 }
 0x270   :  { %v344_v12 = vsel %vm343_vm4, %v783_v1, %v340_v9  ;;  %v347_v14 = vmul.f32 %v785_v8, %v346_v11  ;;  %v489_v1 = vld [vmem:[#allocation10 + $0xb8] sm:$0xff]  ;;  %v480_v9 = vld [vmem:[#allocation10 + $0x70] sm:$0xff]  ;;  %v412_v11 = vperm.slane %v1079_v5, 6 }
 0x271   :  { %v355_v15 = vmul.f32 %v344_v12, %v331_v10  ;;  %525 = vmatpush.msrb.mxu0 %v489_v1  ;;  %503 = vmatpush.msra.mxu3 %v486_v2  ;;  %v481_v10 = vld [vmem:[#allocation10 + $0x78] sm:$0xff] }
 0x272   :  { %v348_v13 = vmul.f32 0.5, %v347_v14  ;;  %612 = vmatpush.msrb.mxu2 %v486_v2  ;;  %v992_v2 = vmov 1.0  }
 0x273   :  { %v358_v17 = vmul.f32 %v357_v23, %v355_v15  ;;  %526 = vmatpush.msrb.mxu0 %v487_v3  ;;  %504 = vmatpush.msra.mxu3 %v484_v4 }
 0x274   :  { %v349_v18 = vsub.f32 1.5, %v348_v13  ;;  %613 = vmatpush.msrb.mxu2 %v484_v4  ;;  %v479_v13 = vld [vmem:[#allocation10 + $0x68] sm:$0xff] }
 0x275   :  { %v361_v19 = vadd.f32 %v360_v16, %v358_v17  ;;  %527 = vmatpush.msrb.mxu0 %v485_v6  ;;  %505 = vmatpush.msra.mxu3 %v482_v7  ;;  %v476_v17 = vld [vmem:[#allocation10 + $0x50] sm:$0xff] }
 0x276   :  { %v350_v20 = vmul.f32 %v785_v8, %v349_v18  ;;  %614 = vmatpush.msrb.mxu2 %v482_v7  ;;  %v477_v18 = vld [vmem:[#allocation10 + $0x58] sm:$0xff] }
 0x277   :  { %v712_v21 = vmul.f32 -1.442695, %v361_v19  ;;  %506 = vmatpush.msra.mxu3 %v480_v9 }
 0x278   :  { %v354_v24 = vsel %vm353_vm7, %v785_v8, %v350_v20  ;;  %v483_v8 = vld [vmem:[#allocation10 + $0x88] sm:$0xff]  ;;  %615 = vmatpush.msrb.mxu2 %v480_v9 }
 0x279   :  { %786 = vpow2.f32 %v712_v21  ;;  %v356_v25 = vmul.f32 %v354_v24, %v332_v22  ;;  %528 = vmatpush.msrb.mxu0 %v483_v8  ;;  %v475_v20 = vld [vmem:[#allocation10 + $0x48] sm:$0xff]  ;;  %v472_v21 = vld [vmem:[#allocation10 + $0x30] sm:$0xff]  ;;  %v473_v22 = vld [vmem:[#allocation10 + $0x38] sm:$0xff] }
 0x27a   :  { %v470_v24 = vld [vmem:[#allocation10 + $0x20] sm:$0xff] }
 0x27b   :  { %v359_v26 = vmul.f32 %v357_v23, %v356_v25  ;;  %529 = vmatpush.msrb.mxu0 %v481_v10  ;;  %v471_v25 = vld [vmem:[#allocation10 + $0x28] sm:$0xff] }
 0x27d   :  { %v362_v27 = vadd.f32 %v360_v16, %v359_v26  ;;  %v478_v16 = vld [vmem:[#allocation10 + $0x60] sm:$0xff]  ;;  %530 = vmatpush.msrb.mxu0 %v479_v13  ;;  %v468_v26 = vld [vmem:[#allocation10 + $0x10] sm:$0xff] }
 0x27e   :  { %507 = vmatpush.msra.mxu3 %v478_v16  ;;  %616 = vmatpush.msrb.mxu2 %v478_v16  ;;  %v995_v16 = vmov 0.0  }
 0x27f   :  { %v787_v28 = vpop.eup %786  ;;  %v713_v29 = vmul.f32 -1.442695, %v362_v27  ;;  %531 = vmatpush.msrb.mxu0 %v477_v18 }
 0x280   :  { %v369_v30 = vadd.f32 1.0, %v787_v28  ;;  %508 = vmatpush.msra.mxu3 %v476_v17  ;;  %617 = vmatpush.msrb.mxu2 %v476_v17  ;;  %v466_v28 = vld [vmem:[#allocation10] sm:$0xff] }
 0x281   :  { %788 = vpow2.f32 %v713_v29  ;;  %532 = vmatpush.msrb.mxu0 %v475_v20  ;;  %v467_v29 = vld [vmem:[#allocation10 + $0x8] sm:$0xff] }
 0x282   :  { %790 = vrcp.f32 %v369_v30  ;;  %v382_v40 = vand.u32 2147483648, %v369_v30  ;;  %vm376_vm9 = vweird.f32 %v369_v30  ;;  %v380_v41 = vand.u32 2147483647, %v369_v30 }
 0x283   :  { %533 = vmatpush.msrb.mxu0 %v473_v22 }
 0x284   :  { %v383_v47 = vor.u32 1.1754944e-38, %v382_v40  ;;  %vm381_vm12 = vcmp.eq.f32.partialorder %v380_v41, 8.507059e+37 }
 0x285   :  { %534 = vmatpush.msrb.mxu0 %v471_v25 }
 0x287   :  { %v789_v31 = vpop.eup %788 }
 0x288   :  { %v791_v32 = vpop.eup %790  ;;  %v370_v33 = vadd.f32 1.0, %v789_v31  ;;  %v565_v31 = vld [vmem:[%s1143_s1] sm:$0xff] }
 0x289   :  { %v372_v34 = vmul.f32 %v791_v32, %v369_v30  ;;  %vm377_vm8 = vweird.f32 %v791_v32  ;;  %v567_v30 = vld [vmem:[%s1149_s7] sm:$0xff] }
 0x28a   :  { %792 = vrcp.f32 %v370_v33  ;;  %vm378_vm10 = vmor %vm376_vm9, %vm377_vm8  ;;  %v397_v43 = vand.u32 2147483648, %v370_v33  ;;  %v395_v46 = vand.u32 2147483647, %v370_v33  ;;  %vm391_vm13 = vweird.f32 %v370_v33  ;;  %590 = vmatpush.msrb.mxu1 %v567_v30 }
 0x28b   :  { %v373_v35 = vsub.f32 1.0, %v372_v34 }
 0x28c   :  { %v398_v50 = vor.u32 1.1754944e-38, %v397_v43  ;;  %vm396_vm15 = vcmp.eq.f32.partialorder %v395_v46, 8.507059e+37 }
 0x28d   :  { %v374_v36 = vmul.f32 %v791_v32, %v373_v35 }
 0x28f   :  { %v375_v38 = vadd.f32 %v791_v32, %v374_v36 }
 0x290   :  { %v793_v37 = vpop.eup %792 }
 0x291   :  { %v387_v39 = vmul.f32 %v793_v37, %v370_v33  ;;  %v379_v44 = vsel %vm378_vm10, %v791_v32, %v375_v38  ;;  %vm392_vm11 = vweird.f32 %v793_v37  ;;  %v566_v32 = vld [vmem:[%s1143_s1 + $0x8] sm:$0xff]  ;;  %s993_s1 = smov [#allocation11]  }
 0x292   :  { %v384_v49 = vsel %vm381_vm12, %v383_v47, %v379_v44  ;;  %vm393_vm14 = vmor %vm391_vm13, %vm392_vm11  ;;  %s649_s7 = sshll.u32 %s993_s1, 4  ;;  %s650_s7 = int_to_ptr.vmem [resolvable:$true] %s649_s7 }
 0x293   :  { %v388_v42 = vsub.f32 1.0, %v387_v39  ;;  %v401_v53 = vmul.f32 %v384_v49, %v361_v19  ;;  %v474_v19 = vld [vmem:[#allocation10 + $0x40] sm:$0xff] }
 0x294   :  { %509 = vmatpush.msra.mxu3 %v474_v19  ;;  %618 = vmatpush.msrb.mxu2 %v474_v19 }
 0x295   :  { %v389_v45 = vmul.f32 %v793_v37, %v388_v42 }
 0x296   :  { %510 = vmatpush.msra.mxu3 %v472_v21  ;;  %619 = vmatpush.msrb.mxu2 %v472_v21 }
 0x297   :  { %v390_v48 = vadd.f32 %v793_v37, %v389_v45 }
 0x298   :  { %511 = vmatpush.msra.mxu3 %v470_v24  ;;  %620 = vmatpush.msrb.mxu2 %v470_v24 }
 0x299   :  { %v394_v51 = vsel %vm393_vm14, %v793_v37, %v390_v48 }
 0x29a   :  { %v399_v52 = vsel %vm396_vm15, %v398_v50, %v394_v51  ;;  %512 = vmatpush.msra.mxu3 %v468_v26  ;;  %621 = vmatpush.msrb.mxu2 %v468_v26  ;;  %v113_v50 = vld [vmem:[#allocation8 + $0x8] sm:$0xff] }
 0x29b   :  { %v402_v54 = vmul.f32 %v399_v52, %v362_v27  ;;  %v469_v27 = vld [vmem:[#allocation10 + $0x18] sm:$0xff]  ;;  %v562_v52 = vperm.slane %v1079_v5, 7  ;;  %v598_v57 = vperm.slane %v113_v50, 0  ;;  %v630_v9 = vperm.slane %v113_v50, 1 }
 0x29c   :  { %535 = vmatpush.msrb.mxu0 %v469_v27  ;;  %513 = vmatpush.msra.mxu3 %v466_v28 }
 0x29d   :  { %v403_v55 = vpack.c.bf16 %v402_v54, %v401_v53  ;;  %622 = vmatpush.msrb.mxu2 %v466_v28 }
 0x29e   :  { %536 = vmatpush.msrb.mxu0 %v467_v29 }
 0x29f   :  { %730 = vmatmul.msk.bf16.vlgmr.msra.gmra.mxu2 %vm152_vm1, %v403_v55  ;;  %vm568_vm1 = vcmask 64512  }
 0x2a0   :  { %731 = vmatmul.msk.f32.vlgmr.msrb.gmra.mxu1 %vm568_vm1, %v565_v31 }
 0x2a8   :  { %732 = vmatmul.msk.f32.gmra.mxu1 %vm568_vm1, %v566_v32 }
 0x31d   :  { %v592_v58 = vpop.f32.mrf.mxu1 }
 0x322   :  { %v449_v23 = vpop.f32.mrf.mxu2 }
 0x323   :  { %v450_v12 = vadd.f32 %v449_v23, %v412_v11 }
 0x325   :  { %454 = vmax.xlane.f32.xlu2 %v450_v12  ;;  %v595_v7 = vpop.f32.mrf.mxu1 }
 0x32a   :  { %v451_v14 = vpop.f32.mrf.mxu2 }
 0x32b   :  { %v452_v15 = vadd.f32 %v451_v14, %v412_v11 }
 0x32d   :  { %456 = vmax.xlane.f32.xlu0 %v452_v15 }
 0x398   :  { %v455_v33 = vpop.xlane.xlu2 %454 }
 0x399   :  { %v458_v34 = vsub.f32 %v450_v12, %v455_v33 }
 0x39b   :  { %v460_v35 = vmax.f32 %v458_v34, -85.0 }
 0x39d   :  { %v462_v36 = vmul.f32 1.442695, %v460_v35 }
 0x39f   :  { %794 = vpow2.f32 %v462_v36 }
 0x3a0   :  { %v457_v37 = vpop.xlane.xlu0 %456 }
 0x3a1   :  { %v459_v38 = vsub.f32 %v452_v15, %v457_v37 }
 0x3a3   :  { %v461_v39 = vmax.f32 %v459_v38, -85.0 }
 0x3a5   :  { %v795_v40 = vpop.eup %794  ;;  %v464_v41 = vmul.f32 1.442695, %v461_v39 }
 0x3a6   :  { %514 = vmatmul.f32.vlgmr.msra.gmra.mxu3 %v795_v40  ;;  %537 = vmatmul.f32.vlgmr.msrb.gmra.mxu0 %v795_v40 }
 0x3a7   :  { %796 = vpow2.f32 %v464_v41 }
 0x3ad   :  { %v797_v42 = vpop.eup %796 }
 0x3ae   :  { %517 = vmatmul.f32.gmra.mxu3 %v797_v42  ;;  %540 = vmatmul.f32.gmra.mxu0 %v797_v42 }
 0x423   :  { %v538_v49 = vpop.f32.mrf.mxu0 }
 0x429   :  { %v515_v43 = vpop.f32.mrf.mxu3 }
 0x42a   :  { %798 = vrcp.f32 %v515_v43 }
 0x42b   :  { %v541_v1 = vpop.f32.mrf.mxu0 }
 0x430   :  { %v799_v44 = vpop.eup %798 }
 0x431   :  { %v546_v45 = vmul.f32 %v799_v44, %v515_v43  ;;  %v518_v46 = vpop.f32.mrf.mxu3 }
 0x432   :  { %800 = vrcp.f32 %v518_v46 }
 0x433   :  { %v548_v47 = vsub.f32 2.0, %v546_v45 }
 0x435   :  { %v550_v48 = vmul.f32 %v799_v44, %v548_v47 }
 0x437   :  { %v552_v51 = vmul.f32 0.99, %v550_v48 }
 0x438   :  { %v801_v53 = vpop.eup %800 }
 0x439   :  { %v554_v54 = vmul.f32 %v795_v40, %v552_v51  ;;  %v547_v55 = vmul.f32 %v801_v53, %v518_v46  ;;  %v560_v56 = vmul.f32 %v552_v51, %v538_v49 }
 0x43b   :  { %v556_v59 = vadd.f32 0.000625, %v554_v54  ;;  %v549_v60 = vsub.f32 2.0, %v547_v55  ;;  %v563_v61 = vadd.f32 %v562_v52, %v560_v56 }
 0x43d   :  { %558 = vst [vmem:[#allocation11] sm:$0xff] %v556_v59  ;;  %v551_v62 = vmul.f32 %v801_v53, %v549_v60  ;;  %v599_v63 = vadd.f32 %v598_v57, %v563_v61 }
 0x43f   :  { %v553_v0 = vmul.f32 0.99, %v551_v62  ;;  %vm601_vm0 = vcmp.ge.f32.partialorder %v592_v58, %v599_v63 }
 0x440   :  { %735 = vmatmul.msk.f32.vlgmr.msrb.gmra.mxu2 %vm601_vm0, %v992_v2 }
 0x441   :  { %v555_v3 = vmul.f32 %v797_v42, %v553_v0  ;;  %v561_v4 = vmul.f32 %v553_v0, %v541_v1 }
 0x443   :  { %v557_v5 = vadd.f32 0.000625, %v555_v3  ;;  %v564_v6 = vadd.f32 %v562_v52, %v561_v4 }
 0x445   :  { %559 = vst [vmem:[#allocation11 + $0x8] sm:$0xff] %v557_v5  ;;  %v600_v8 = vadd.f32 %v598_v57, %v564_v6 }
 0x446   :  { %657 = dma.vmem_to_hbm [thread:$0]  %s650_s7, 256, %s652_s27, [#allocation4], %s984_s21, %s984_s21, %s985_s3  }
 0x447   :  { %vm602_vm2 = vcmp.ge.f32.partialorder %v595_v7, %v600_v8 }
 0x448   :  { %736 = vmatmul.msk.f32.gmra.mxu2 %vm602_vm2, %v992_v2 }
 0x4c3   :  { %v624_v10 = vpop.f32.mrf.mxu2 }
 0x4c4   :  { %v631_v11 = vsub.f32 %v630_v9, %v624_v10 }
 0x4c6   :  { %v633_v23 = vand.u32 2147483647, %v631_v11 }
 0x4c8   :  { %vm635_vm3 = vcmp.lt.f32.partialorder %v633_v23, 0.5 }
 0x4c9   :  { %v737_v13 = vsel %vm635_vm3, 1.0, %v995_v16 }
 0x4cb   :  { %v627_v12 = vpop.f32.mrf.mxu2 }
 0x4cc   :  { %v632_v14 = vsub.f32 %v630_v9, %v627_v12 }
 0x4ce   :  { %v634_v15 = vand.u32 2147483647, %v632_v14 }
 0x4d0   :  { %vm636_vm4 = vcmp.lt.f32.partialorder %v634_v15, 0.5 }
 0x4d1   :  { %v738_v17 = vsel %vm636_vm4, 1.0, %v995_v16 }
 0x4d2   :  { %v750_v18 = vpack.c.bf16 %v738_v17, %v737_v13 }
 0x4d4   :  { %751 = vst [vmem:[#allocation12] sm:$0xff] %v750_v18  }
 0x4d5   :  { %670 = dma.vmem_to_hbm [thread:$0]  %s663_s29, 128, %s665_s8, [#allocation13], %s981_s17, %s981_s17, %s982_s18  }
 0x4d6   :  { %976 = dma.done.wait [#allocation4], 256  }
 0x4d7   :  { %977 = vsyncadd [#allocation4], 4294967040 }
 0x4d8   :  { %978 = dma.done.wait [#allocation13], 128  }
 0x4d9   :  { %979 = vsyncadd [#allocation13], 4294967168 }
 0x4da   :  { %679 = vsyncpa [#allocation3], 1 }
 0x4db   :  { %680 = vsyncpa [#allocation6], 1 }
 0x4dc   :  { %681 = vsyncpa [#allocation9], 1 }
 0x4dd   :  { %682 = vsyncpa [#allocation4], 1 }
 0x4de   :  { %683 = vsyncpa [#allocation13], 1 }

</bundles_post_ra>
